<compile_context>
chip_gen: v7x
topology: tpu7x:2x2x1
jax: 0.10.0
libtpu: 0.0.40
codegen_flags: <defaults>
</compile_context>

<pallas_src>
import jax
import jax.numpy as jnp
from jax.experimental import pallas as pl
from jax.experimental.pallas import tpu as pltpu

_LANE = 128
_SUBLANES = {4: 8, 2: 16, 1: 32}            # packed sublanes per itemsize
_TARGET_BLOCK_BYTES = 2 * 1024 * 1024       # ~2 MiB block: BW-bound, fits all gens
_VMEM_LIMIT_BYTES = 32 * 1024 * 1024        # 2 bufs x (in+out) x 2 MiB << 32 MiB


def _copy_kernel(x_ref, o_ref):
    # identity copy of the current tile (the whole "view" data path)
    o_ref[...] = x_ref[...]


def _resolve_size(numel, size):
    """Resolve a torch-style size tuple (supports a single -1)."""
    size = tuple(int(s) for s in size)
    if -1 in size:
        idx = size.index(-1)
        known = 1
        for i, s in enumerate(size):
            if i != idx:
                known *= s
        assert known > 0 and numel % known == 0, \
            "view size incompatible with number of elements"
        size = size[:idx] + (numel // known,) + size[idx + 1:]
    prod = 1
    for s in size:
        prod *= s
    assert prod == numel, "view size incompatible with number of elements"
    return size


def _pick_width(numel_aligned):
    """Largest lane-dense width (multiple of 128, <= 4096) dividing the stream."""
    for w in (4096, 2048, 1024, 512, 256, 128):
        if numel_aligned % w == 0:
            return w
    return _LANE


def pallas_view(x, size):
    """Equivalent of torch.Tensor.view(size) with the data path in Pallas."""
    numel = x.size
    out_size = _resolve_size(numel, size)
    itemsize = jnp.dtype(x.dtype).itemsize
    subl = _SUBLANES.get(itemsize, 8)

    flat = x.reshape(-1)  # row-major flatten: metadata-only under jit

    numel_aligned = (numel // _LANE) * _LANE
    tail = numel - numel_aligned

    if numel_aligned == 0:
        # Degenerate / sub-lane-sized tensor: a view is pure metadata anyway.
        return flat.reshape(out_size)

    width = _pick_width(numel_aligned)
    rows = numel_aligned // width

    # ~_TARGET_BLOCK_BYTES per block, rows aligned to the packed sublane count.
    block_rows = max(subl,
                     (_TARGET_BLOCK_BYTES // (itemsize * width)) // subl * subl)
    if block_rows >= rows:
        block_rows = rows  # full-extent block (always legal)
    grid = (pl.cdiv(rows, block_rows),)  # ragged last block is masked by Pallas

    main = flat if tail == 0 else flat[:numel_aligned]
    slab = main.reshape(rows, width)

    out_slab = pl.pallas_call(
        _copy_kernel,
        out_shape=jax.ShapeDtypeStruct((rows, width), slab.dtype),
        grid_spec=pltpu.PrefetchScalarGridSpec(
            num_scalar_prefetch=0,
            grid=grid,
            in_specs=[pl.BlockSpec((block_rows, width), lambda i: (i, 0))],
            out_specs=pl.BlockSpec((block_rows, width), lambda i: (i, 0)),
        ),
        compiler_params=pltpu.CompilerParams(
            dimension_semantics=("parallel",),
            vmem_limit_bytes=_VMEM_LIMIT_BYTES,
        ),
        cost_estimate=pl.CostEstimate(
            flops=0,
            transcendentals=0,
            bytes_accessed=2 * numel_aligned * itemsize,
        ),
    )(slab)

    out_flat = out_slab.reshape(-1)
    if tail:
        # <128-element ragged lane tail for non-128-aligned sizes; tiny copy.
        out_flat = jnp.concatenate([out_flat, flat[numel_aligned:]])
    return out_flat.reshape(out_size)


if __name__ == "__main__":
    key = jax.random.PRNGKey(0)
    # Example input consistent with a typical conv feature map (NCHW).
    x = jax.random.normal(key, (2, 4, 16, 16), dtype=jnp.float32)

    view_fn = jax.jit(pallas_view, static_argnums=1)

    # View(size=(2, -1)) -> flatten the per-sample feature map.
    out = jax.block_until_ready(view_fn(x, (2, -1)))
    ref = x.reshape(2, -1)
    assert out.shape == ref.shape, (out.shape, ref.shape)
    assert out.dtype == ref.dtype
    assert bool(jnp.all(out == ref))

    # bf16 path (16-sublane packed tile).
    xb = x.astype(jnp.bfloat16)
    outb = jax.block_until_ready(view_fn(xb, (8, -1)))
    assert bool(jnp.all(outb == xb.reshape(8, -1)))

    # Non-lane-aligned degenerate size (pure-metadata fallback path).
    xs = jax.random.normal(jax.random.PRNGKey(0), (3, 5, 7), dtype=jnp.float32)
    outs = jax.block_until_ready(view_fn(xs, (-1,)))
    assert bool(jnp.all(outs == xs.reshape(-1)))

    print("KERNEL_OK")
</pallas_src>

<mosaic_0001>
module attributes {stable_mosaic.version = 11 : i64} {
  func.func @_copy_kernel(%arg0: i32, %arg1: memref<1x2048xf32, #tpu.memory_space<vmem>>, %arg2: memref<1x2048xf32, #tpu.memory_space<vmem>>) attributes {dimension_semantics = [#tpu.dimension_semantics<parallel>], iteration_bounds = array<i64: 1>, scalar_prefetch = 0 : i64, scratch_operands = 0 : i64, tpu.core_type = #tpu.core_type<tc>, window_params = [{transform_indices = @transform_0, window_bounds = array<i64: 1, 2048>}, {transform_indices = @transform_1, window_bounds = array<i64: 1, 2048>}]} {
    %c0 = arith.constant 0 : index
    %c0_0 = arith.constant 0 : index
    %0 = vector.load %arg1[%c0, %c0_0] : memref<1x2048xf32, #tpu.memory_space<vmem>>, vector<1x2048xf32>
    %c0_1 = arith.constant 0 : index
    %c0_2 = arith.constant 0 : index
    %1 = vector.load %arg2[%c0_1, %c0_2] : memref<1x2048xf32, #tpu.memory_space<vmem>>, vector<1x2048xf32>
    tpu.vector_store %arg2[%c0_1, %c0_2], %0 {strides = array<i32>} : memref<1x2048xf32, #tpu.memory_space<vmem>>, vector<1x2048xf32>,
    return
  }
  func.func @transform_0(%arg0: i32) -> (i32, i32) {
    %c0_i32 = arith.constant 0 : i32
    %c0_i32_0 = arith.constant 0 : i32
    return %arg0, %c0_i32 : i32, i32
  }
  func.func @transform_1(%arg0: i32) -> (i32, i32) {
    %c0_i32 = arith.constant 0 : i32
    %c0_i32_0 = arith.constant 0 : i32
    return %arg0, %c0_i32 : i32, i32
  }
}

</mosaic_0001>

<bundles_post_ra>
// kernel: pallas_view.1
= control target key start
LH: loop header
LB: loop body
LE: loop exit
PB: predicated region body
PF: predicated region fallthrough
CT: control target
= control target key end

     0   :  { %s38_s0 = inlined_call_operand.vmem [shape: f32[1,2048], index: 0, kind: input, shape index: {}]   ;;  %s39_s1 = inlined_call_operand.vmem [shape: f32[1,2048], index: 1, kind: output, shape index: {}]  }
   0x1   :  { %v8_v0 = vld [vmem:[%s38_s0] sm:$0xff]  ;;  %v9_v1 = vld [vmem:[%s38_s0 + $0x8] sm:$0xff] }
   0x2   :  { %10 = vst [vmem:[%s39_s1] sm:$0xff] %v8_v0  ;;  %11 = vst [vmem:[%s39_s1 + $0x8] sm:$0xff] %v9_v1 }

</bundles_post_ra>
